<compile_context>
chip_gen: v7x
topology: tpu7x:2x2x1
jax: 0.10.0
libtpu: 0.0.40
codegen_flags: <defaults>
</compile_context>

<pallas_src>
import functools

import jax
import jax.numpy as jnp
from jax.experimental import pallas as pl
from jax.experimental.pallas import tpu as pltpu


def _round_up(x, m):
    return (x + m - 1) // m * m


def _pick_rows(m, target, align):
    """Row tile + padded rows: tile divides padded extent, multiple of `align`."""
    mp = _round_up(m, align)
    if mp <= target:
        return mp, mp
    return target, _round_up(m, target)


def _pick_k(k):
    """K tile + padded K. Prefer 256/128 tiles when aligned; else full-extent block
    (no padding) for K >= 128, or pad small K up to 128."""
    if k % 128 == 0:
        return (256 if k % 256 == 0 else 128), k
    if k < 128:
        return 128, 128
    return k, k


def _pick_n(n):
    np_ = _round_up(n, 128)          # keep output lane-dense (unmasked stores)
    return (256 if np_ % 256 == 0 else 128), np_


_VMEM_LIMIT = 32 * 1024 * 1024       # safe on v5e (128 MiB), v6e (128), v7x (64)


# ----------------------------- Pallas kernels -----------------------------

def _mm_kernel(a_ref, b_ref, bias_ref, o_ref, *, apply_relu):
    """bf16 x bf16 -> f32, accumulate directly in the resident output block."""
    k = pl.program_id(2)

    @pl.when(k == 0)
    def _():
        o_ref[...] = jnp.zeros_like(o_ref)

    o_ref[...] += jnp.dot(a_ref[...], b_ref[...],
                          preferred_element_type=jnp.float32)

    @pl.when(k == pl.num_programs(2) - 1)
    def _():
        r = o_ref[...] + bias_ref[...]
        if apply_relu:
            r = jnp.maximum(r, 0.0)
        o_ref[...] = r


def _mm_bn_kernel(a_ref, scale_ref, shift_ref, b_ref, bias_ref, o_ref, *,
                  apply_relu):
    """Fused (BN -> ReLU -> matmul): A is f32, per-K-column scale/shift applied on the
    VPU before the MXU dot. Correct for 1x1 convs (no spatial zero padding)."""
    k = pl.program_id(2)

    @pl.when(k == 0)
    def _():
        o_ref[...] = jnp.zeros_like(o_ref)

    a = jnp.maximum(a_ref[...] * scale_ref[...] + shift_ref[...], 0.0)
    o_ref[...] += jnp.dot(a.astype(jnp.bfloat16), b_ref[...],
                          preferred_element_type=jnp.float32)

    @pl.when(k == pl.num_programs(2) - 1)
    def _():
        r = o_ref[...] + bias_ref[...]
        if apply_relu:
            r = jnp.maximum(r, 0.0)
        o_ref[...] = r


def pallas_matmul(a, b, bias=None, *, apply_relu=False,
                  bn_scale=None, bn_shift=None):
    """a: (M, K), b: (K, N) -> (M, N) f32.
    Optional fused pre-activation BN+ReLU on A (bn_scale/bn_shift over K)."""
    M, K = a.shape
    K2, N = b.shape
    assert K == K2
    fused_bn = bn_scale is not None

    tm, Mp = _pick_rows(M, target=256, align=8)
    tk, Kp = _pick_k(K)
    tn, Np = _pick_n(N)

    a_p = a.astype(jnp.float32) if fused_bn else a.astype(jnp.bfloat16)
    if (Mp, Kp) != (M, K):
        a_p = jnp.pad(a_p, ((0, Mp - M), (0, Kp - K)))

    b_p = b.astype(jnp.bfloat16)
    if (Kp, Np) != (K, N):
        b_p = jnp.pad(b_p, ((0, Kp - K), (0, Np - N)))

    if bias is None:
        bias_p = jnp.zeros((1, Np), jnp.float32)
    else:
        bias_p = bias.astype(jnp.float32).reshape(1, N)
        if Np != N:
            bias_p = jnp.pad(bias_p, ((0, 0), (0, Np - N)))

    a_spec = pl.BlockSpec((tm, tk), lambda i, j, k: (i, k))
    b_spec = pl.BlockSpec((tk, tn), lambda i, j, k: (k, j))
    bias_spec = pl.BlockSpec((1, tn), lambda i, j, k: (0, j))
    out_spec = pl.BlockSpec((tm, tn), lambda i, j, k: (i, j))

    cparams = pltpu.CompilerParams(
        dimension_semantics=("parallel", "parallel", "arbitrary"),
        vmem_limit_bytes=_VMEM_LIMIT)

    if fused_bn:
        s_p = bn_scale.astype(jnp.float32).reshape(1, K)
        t_p = bn_shift.astype(jnp.float32).reshape(1, K)
        if Kp != K:
            s_p = jnp.pad(s_p, ((0, 0), (0, Kp - K)))
            t_p = jnp.pad(t_p, ((0, 0), (0, Kp - K)))
        kernel = functools.partial(_mm_bn_kernel, apply_relu=apply_relu)
        in_specs = [a_spec,
                    pl.BlockSpec((1, tk), lambda i, j, k: (0, k)),
                    pl.BlockSpec((1, tk), lambda i, j, k: (0, k)),
                    b_spec, bias_spec]
        args = (a_p, s_p, t_p, b_p, bias_p)
    else:
        kernel = functools.partial(_mm_kernel, apply_relu=apply_relu)
        in_specs = [a_spec, b_spec, bias_spec]
        args = (a_p, b_p, bias_p)

    out = pl.pallas_call(
        kernel,
        out_shape=jax.ShapeDtypeStruct((Mp, Np), jnp.float32),
        grid=(Mp // tm, Np // tn, Kp // tk),
        in_specs=in_specs,
        out_specs=out_spec,
        compiler_params=cparams,
    )(*args)

    if (Mp, Np) != (M, N):
        out = out[:M, :N]
    return out


def _bn_relu_kernel(x_ref, scale_ref, shift_ref, o_ref):
    y = jnp.maximum(x_ref[...] * scale_ref[...] + shift_ref[...], 0.0)
    o_ref[...] = y.astype(o_ref.dtype)


def pallas_bn_relu(x2d, scale, shift, out_dtype=jnp.bfloat16):
    """Row-tiled inference BatchNorm (pre-folded affine) + ReLU. x2d: (M, C).
    Emits bf16 so the following im2col + matmul read half the bytes."""
    M, C = x2d.shape
    tm, Mp = _pick_rows(M, target=512, align=16)
    x_p = x2d.astype(jnp.float32)
    if Mp != M:
        x_p = jnp.pad(x_p, ((0, Mp - M), (0, 0)))
    s = scale.astype(jnp.float32).reshape(1, C)
    t = shift.astype(jnp.float32).reshape(1, C)
    out = pl.pallas_call(
        _bn_relu_kernel,
        out_shape=jax.ShapeDtypeStruct((Mp, C), out_dtype),
        grid=(Mp // tm,),
        in_specs=[pl.BlockSpec((tm, C), lambda i: (i, 0)),
                  pl.BlockSpec((1, C), lambda i: (0, 0)),
                  pl.BlockSpec((1, C), lambda i: (0, 0))],
        out_specs=pl.BlockSpec((tm, C), lambda i: (i, 0)),
        compiler_params=pltpu.CompilerParams(
            dimension_semantics=("parallel",),
            vmem_limit_bytes=_VMEM_LIMIT),
    )(x_p, s, t)
    if Mp != M:
        out = out[:M]
    return out


def _bn_relu_gap_kernel(x_ref, scale_ref, shift_ref, o_ref):
    y = jnp.maximum(x_ref[...] * scale_ref[...] + shift_ref[...], 0.0)  # (1,HW,C)
    o_ref[...] = jnp.mean(y, axis=1, keepdims=True)                     # (1,1,C)


def pallas_bn_relu_gap(x_nhwc, scale, shift):
    """Fused final BN + ReLU + global average pool: (N,H,W,C) -> (N,C)."""
    N, H, W, C = x_nhwc.shape
    HW = H * W
    x3 = x_nhwc.reshape(N, HW, C).astype(jnp.float32)
    s = scale.astype(jnp.float32).reshape(1, 1, C)
    t = shift.astype(jnp.float32).reshape(1, 1, C)
    out = pl.pallas_call(
        _bn_relu_gap_kernel,
        out_shape=jax.ShapeDtypeStruct((N, 1, C), jnp.float32),
        grid=(N,),
        in_specs=[pl.BlockSpec((1, HW, C), lambda b: (b, 0, 0)),
                  pl.BlockSpec((1, 1, C), lambda b: (0, 0, 0)),
                  pl.BlockSpec((1, 1, C), lambda b: (0, 0, 0))],
        out_specs=pl.BlockSpec((1, 1, C), lambda b: (b, 0, 0)),
        compiler_params=pltpu.CompilerParams(
            dimension_semantics=("parallel",),
            vmem_limit_bytes=_VMEM_LIMIT),
    )(x3, s, t)
    return out.reshape(N, C)


# ------------------------- conv / pooling helpers -------------------------

def _im2col_3x3(x_bf16):
    # x: (N, H, W, C) NHWC bf16; 3x3 "same" conv, stride 1, zero padding 1.
    # TODO(synk): im2col still materializes a 9x patch matrix in HBM (in bf16);
    # a tap-accumulating conv kernel would remove it entirely.
    N, H, W, C = x_bf16.shape
    xp = jnp.pad(x_bf16, ((0, 0), (1, 1), (1, 1), (0, 0)))
    cols = [xp[:, dh:dh + H, dw:dw + W, :] for dh in range(3) for dw in range(3)]
    return jnp.concatenate(cols, axis=-1).reshape(N * H * W, 9 * C)


def conv3x3(x, wm2d):
    # wm2d: (9*Cin, Cout) bf16 (pre-reshaped/cast at init)
    N, H, W, C = x.shape
    patches = _im2col_3x3(x.astype(jnp.bfloat16))
    y = pallas_matmul(patches, wm2d)
    return y.reshape(N, H, W, -1)


def avg_pool_2x2(x):
    # tiny glue reduction between blocks, kept in plain JAX
    N, H, W, C = x.shape
    return x.reshape(N, H // 2, 2, W // 2, 2, C).mean(axis=(2, 4))


def _fold_bn(bn, eps=1e-5):
    scale = bn["gamma"] / jnp.sqrt(bn["var"] + eps)
    shift = bn["beta"] - bn["mean"] * scale
    return scale, shift


# ------------------------------ parameters --------------------------------

STEM = 64               # channels after the stem conv
GROWTH = 64             # growth rate per dense layer
BLOCKS = (2, 2, 4)      # dense layers per block
TRANS_OUT = (128, 256)  # transition 1x1-conv output channels
FEAT = 512              # final feature dim -> Linear(512, output)


def _bn_params(key, c):
    k1, k2, k3, k4 = jax.random.split(key, 4)
    return dict(
        gamma=1.0 + 0.1 * jax.random.normal(k1, (c,), jnp.float32),
        beta=0.1 * jax.random.normal(k2, (c,), jnp.float32),
        mean=0.1 * jax.random.normal(k3, (c,), jnp.float32),
        var=1.0 + 0.1 * jax.random.uniform(k4, (c,), jnp.float32),
    )


def _conv_w_2d(key, kh, kw, cin, cout):
    """He-init conv weight, pre-reshaped to (kh*kw*cin, cout) bf16 for the MXU."""
    fan_in = kh * kw * cin
    w = jax.random.normal(key, (kh, kw, cin, cout), jnp.float32) * (2.0 / fan_in) ** 0.5
    return w.reshape(kh * kw * cin, cout).astype(jnp.bfloat16)


def init_params(key, output=100):
    keys = iter(jax.random.split(key, 64))
    p = {}
    p["stem_w"] = _conv_w_2d(next(keys), 3, 3, 3, STEM)
    c = STEM
    dense_blocks, transitions = [], []
    for bi, n_layers in enumerate(BLOCKS):
        layers = []
        for _ in range(n_layers):
            layers.append(dict(bn=_bn_params(next(keys), c),
                               w=_conv_w_2d(next(keys), 3, 3, c, GROWTH)))
            c += GROWTH
        dense_blocks.append(layers)
        if bi < len(TRANS_OUT):
            transitions.append(dict(bn=_bn_params(next(keys), c),
                                    w=_conv_w_2d(next(keys), 1, 1, c, TRANS_OUT[bi])))
            c = TRANS_OUT[bi]
    assert c == FEAT, c
    p["dense_blocks"] = dense_blocks
    p["transitions"] = transitions
    p["final_bn"] = _bn_params(next(keys), c)
    p["last_w"] = (jax.random.normal(next(keys), (FEAT, output), jnp.float32)
                   * (1.0 / FEAT) ** 0.5)
    p["last_b"] = jnp.zeros((output,), jnp.float32)
    return p


# ------------------------------- forward ----------------------------------

def densenet_features(params, x_nchw):
    x = jnp.transpose(x_nchw, (0, 2, 3, 1)).astype(jnp.float32)  # NCHW -> NHWC
    x = conv3x3(x, params["stem_w"])
    for bi, layers in enumerate(params["dense_blocks"]):
        for layer in layers:
            N, H, W, C = x.shape
            scale, shift = _fold_bn(layer["bn"])
            h = pallas_bn_relu(x.reshape(N * H * W, C), scale, shift)  # bf16
            new = conv3x3(h.reshape(N, H, W, C), layer["w"])
            # TODO(synk): dense-connectivity concat still rewrites the growing
            # activation each layer; could be eliminated by writing the new
            # GROWTH-channel slice in place via output index_map + aliasing.
            x = jnp.concatenate([x, new], axis=-1)
        if bi < len(params["transitions"]):
            tr = params["transitions"][bi]
            N, H, W, C = x.shape
            scale, shift = _fold_bn(tr["bn"])
            # fused BN-ReLU + 1x1 conv (exact: 1x1 conv has no spatial padding)
            y = pallas_matmul(x.reshape(N * H * W, C), tr["w"],
                              bn_scale=scale, bn_shift=shift)
            x = avg_pool_2x2(y.reshape(N, H, W, -1))
    scale, shift = _fold_bn(params["final_bn"])
    return pallas_bn_relu_gap(x, scale, shift)  # (N, 512)


def rep_tail_densenet_forward(params, x, t, pre=False, is_con=False,
                              nc_per_task=10):
    """Matches RepTailDensnet.forward(x, t, pre, is_con)."""
    h = densenet_features(params, x)                               # (B, 512)
    out = pallas_matmul(h, params["last_w"], params["last_b"])     # (B, output)
    if is_con:
        # TODO(synk): original module reads self.nc_per_task / self.n_outputs
        # which are never assigned in __init__; taken as arguments here.
        n_outputs = out.shape[1]
        if pre:
            offset1, offset2 = 0, int(t * nc_per_task)
        else:
            offset1, offset2 = int(t * nc_per_task), int((t + 1) * nc_per_task)
        col = jnp.arange(n_outputs)
        keep = (col >= offset1) & (col < offset2)
        out = jnp.where(keep[None, :], out, jnp.float32(-100000000000.0))
    return out


if __name__ == "__main__":
    key = jax.random.PRNGKey(0)
    pk, xk = jax.random.split(key)
    params = init_params(pk, output=100)

    # small RGB input, NCHW like PyTorch
    x = jax.random.normal(xk, (2, 3, 16, 16), jnp.float32)

    out = rep_tail_densenet_forward(params, x, t=0)
    out = jax.block_until_ready(out)
    assert out.shape == (2, 100), out.shape
    assert bool(jnp.all(jnp.isfinite(out)))
    print("KERNEL_OK")
</pallas_src>

<mosaic_0001>
module attributes {stable_mosaic.version = 11 : i64} {
  func.func @_mm_kernel(%arg0: i32, %arg1: i32, %arg2: i32, %arg3: memref<256x128xbf16, #tpu.memory_space<vmem>>, %arg4: memref<128x128xbf16, #tpu.memory_space<vmem>>, %arg5: memref<1x128xf32, #tpu.memory_space<vmem>>, %arg6: memref<256x128xf32, #tpu.memory_space<vmem>>) attributes {dimension_semantics = [#tpu.dimension_semantics<parallel>, #tpu.dimension_semantics<parallel>, #tpu.dimension_semantics<arbitrary>], iteration_bounds = array<i64: 2, 1, 1>, scalar_prefetch = 0 : i64, scratch_operands = 0 : i64, tpu.core_type = #tpu.core_type<tc>, window_params = [{transform_indices = @transform_0, window_bounds = array<i64: 256, 128>}, {transform_indices = @transform_1, window_bounds = array<i64: 128, 128>}, {transform_indices = @transform_2, window_bounds = array<i64: 1, 128>}, {transform_indices = @transform_3, window_bounds = array<i64: 256, 128>}]} {
    %c0_i32 = arith.constant 0 : i32
    %0 = arith.cmpi eq, %arg2, %c0_i32 : i32
    %1 = arith.extui %0 : i1 to i32
    %c0_i32_0 = arith.constant 0 : i32
    %2 = arith.cmpi ne, %1, %c0_i32_0 : i32
    scf.if %2 {
      %cst_10 = arith.constant 0.000000e+00 : f32
      %12 = vector.broadcast %cst_10 : f32 to vector<256x128xf32>
      %c0_11 = arith.constant 0 : index
      %c0_12 = arith.constant 0 : index
      %13 = vector.load %arg6[%c0_11, %c0_12] : memref<256x128xf32, #tpu.memory_space<vmem>>, vector<256x128xf32>
      tpu.vector_store %arg6[%c0_11, %c0_12], %12 {strides = array<i32>} : memref<256x128xf32, #tpu.memory_space<vmem>>, vector<256x128xf32>,
    } else {
    }
    %c0 = arith.constant 0 : index
    %c0_1 = arith.constant 0 : index
    %3 = vector.load %arg6[%c0, %c0_1] : memref<256x128xf32, #tpu.memory_space<vmem>>, vector<256x128xf32>
    %c0_2 = arith.constant 0 : index
    %c0_3 = arith.constant 0 : index
    %4 = vector.load %arg3[%c0_2, %c0_3] : memref<256x128xbf16, #tpu.memory_space<vmem>>, vector<256x128xbf16>
    %c0_4 = arith.constant 0 : index
    %c0_5 = arith.constant 0 : index
    %5 = vector.load %arg4[%c0_4, %c0_5] : memref<128x128xbf16, #tpu.memory_space<vmem>>, vector<128x128xbf16>
    %cst = arith.constant dense<0.000000e+00> : vector<256x128xf32>
    %6 = tpu.matmul %4, %5, %cst {dimension_numbers = #tpu.dot_dimension_numbers<[1], [0], [0], [1], [0, 0, 1, 1], [], []>} : vector<256x128xbf16>, vector<128x128xbf16>, vector<256x128xf32> -> vector<256x128xf32>
    %7 = arith.addf %3, %6 : vector<256x128xf32>
    %c0_6 = arith.constant 0 : index
    %c0_7 = arith.constant 0 : index
    %8 = vector.load %arg6[%c0_6, %c0_7] : memref<256x128xf32, #tpu.memory_space<vmem>>, vector<256x128xf32>
    tpu.vector_store %arg6[%c0_6, %c0_7], %7 {strides = array<i32>} : memref<256x128xf32, #tpu.memory_space<vmem>>, vector<256x128xf32>,
    %c0_i32_8 = arith.constant 0 : i32
    %9 = arith.cmpi eq, %arg2, %c0_i32_8 : i32
    %10 = arith.extui %9 : i1 to i32
    %c0_i32_9 = arith.constant 0 : i32
    %11 = arith.cmpi ne, %10, %c0_i32_9 : i32
    scf.if %11 {
      %c0_10 = arith.constant 0 : index
      %c0_11 = arith.constant 0 : index
      %12 = vector.load %arg6[%c0_10, %c0_11] : memref<256x128xf32, #tpu.memory_space<vmem>>, vector<256x128xf32>
      %c0_12 = arith.constant 0 : index
      %c0_13 = arith.constant 0 : index
      %13 = vector.load %arg5[%c0_12, %c0_13] : memref<1x128xf32, #tpu.memory_space<vmem>>, vector<1x128xf32>
      %14 = vector.broadcast %13 : vector<1x128xf32> to vector<256x128xf32>
      %15 = arith.addf %12, %14 : vector<256x128xf32>
      %c0_14 = arith.constant 0 : index
      %c0_15 = arith.constant 0 : index
      %16 = vector.load %arg6[%c0_14, %c0_15] : memref<256x128xf32, #tpu.memory_space<vmem>>, vector<256x128xf32>
      tpu.vector_store %arg6[%c0_14, %c0_15], %15 {strides = array<i32>} : memref<256x128xf32, #tpu.memory_space<vmem>>, vector<256x128xf32>,
    } else {
    }
    return
  }
  func.func @transform_0(%arg0: i32, %arg1: i32, %arg2: i32) -> (i32, i32) {
    %c0_i32 = arith.constant 0 : i32
    return %arg0, %arg2 : i32, i32
  }
  func.func @transform_1(%arg0: i32, %arg1: i32, %arg2: i32) -> (i32, i32) {
    %c0_i32 = arith.constant 0 : i32
    return %arg2, %arg1 : i32, i32
  }
  func.func @transform_2(%arg0: i32, %arg1: i32, %arg2: i32) -> (i32, i32) {
    %c0_i32 = arith.constant 0 : i32
    %c0_i32_0 = arith.constant 0 : i32
    return %c0_i32, %arg1 : i32, i32
  }
  func.func @transform_3(%arg0: i32, %arg1: i32, %arg2: i32) -> (i32, i32) {
    %c0_i32 = arith.constant 0 : i32
    return %arg0, %arg1 : i32, i32
  }
}

</mosaic_0001>

<bundles_post_ra>
// kernel: tpu_custom_call.1
= control target key start
LH: loop header
LB: loop body
LE: loop exit
PB: predicated region body
PF: predicated region fallthrough
CT: control target
= control target key end

     0   :  { %8 = vsyncpa [#allocation3], 0  ;;  %s1701_s0 = inlined_call_operand.hbm [shape: bf16[512,128], index: 0, kind: input, shape index: {}]   ;;  %s1702_s1 = inlined_call_operand.hbm [shape: bf16[128,128], index: 1, kind: input, shape index: {}]   ;;  %s1703_s2 = inlined_call_operand.vmem [shape: f32[1,128], index: 2, kind: input, shape index: {}]   ;;  %s1704_s3 = inlined_call_operand.hbm [shape: f32[512,128], index: 3, kind: output, shape index: {}]  }
   0x1   :  { %10 = vsyncpa [#allocation3 + $0x1], 0 }
   0x2   :  { %11 = vsyncpa [#allocation6], 0 }
   0x3   :  { %12 = vsyncpa [#allocation4], 0 }
   0x4   :  { %14 = vsyncpa [#allocation4 + $0x1], 0  ;;  %s1385_s12 = smov 0   ;;  %s1387_s13 = smov 0  }
   0x5   :  { %s1389_s14 = smov 0   ;;  %s1391_s15 = smov 0  }
   0x6   :  { %s1393_s16 = smov 0   ;;  %s1395_s17 = smov 0  }
   0x7 LB: > { %s977_s18 = sadd.s32 4294967295, %s1356_s17   ;;  %s978_s19 = sadd.s32 4294967294, %s1356_s17   ;;  %s1356_s17 = sphi %s1395_s17, %s20_s17   ;;  %s1352_s16 = sphi %s1393_s16, %s1728_s16   ;;  %s1348_s15 = sphi %s1391_s15, %s1727_s15   ;;  %s1344_s14 = sphi %s1389_s14, %s1726_s14   ;;  %s1340_s13 = sphi %s1387_s13, %s1725_s13   ;;  %s1336_s12 = sphi %s1385_s12, %s1724_s12  }
   0x8   : > { %p61_p0 = scmp.ne.s32.totalorder %s1340_s13, %s1336_s12  ;;  %p1419_p1 = scmp.eq.s32.totalorder %s977_s18, 0 }
   0x9   : > { %p1423_p2 = scmp.eq.s32.totalorder %s977_s18, 1  ;;  %p147_p3 = scmp.eq.s32.totalorder %s978_s19, 1 }
   0xa   : > { %s1709_s20 = scalar_select %p1419_p1, 1, 0 }
   0xb   : > { %s1710_s21 = scalar_select %p1423_p2, 1, 0 }
   0xc   : > { %p1429_p4 = por %p1419_p1, %p61_p0  ;;  %p979_p5 = scmp.ge.s32.totalorder %s1356_s17, 1 }
   0xd   : > { %p1434_p6 = por %p147_p3, %p61_p0  ;;  %p154_p7 = scmp.lt.s32.totalorder %s1356_s17, 3 }
   0xe   : > { %s1711_s22 = scalar_select %p1429_p4, 1, 0 }
   0xf   : > { %s1712_s23 = scalar_select %p1434_p6, 1, 0 }
  0x10   : > { %p1439_p8 = pnand %p979_p5, %p154_p7  ;;  %s1358_s25 = smov [#allocation5]  }
  0x11   : > { %s170_s26 = sshll.u32 %s1358_s25, 4  ;;  %s39_s28 = sadd.s32 1, %s1352_s16  ;;  %s171_s26 = int_to_ptr.vmem [resolvable:$true] %s170_s26 }
  0x12   : > { %s1713_s24 = scalar_select %p1439_p8, 1, 0 }
  0x13   : > { %p1118_p9 = pneg %p1439_p8  ;;  %s1212_s4 = scalar_lea.hbm %s1702_s1, 1024 }
  0x14   : > { %p1213_p12 = scmp.ne.s32.totalorder %s1702_s1, %s1212_s4  ;;  %p1219_p5 = scmp.lt.u32.totalorder %s1212_s4, %s1702_s1 }
  0x15   : > { %p1448_p11 = pnand %p1118_p9, %p1419_p1 }
  0x17   : > { %p1214_p13 = pneg %p1448_p11 }
  0x19   : > { %p1215_p0 = pnand %p1214_p13, %p1213_p12 }
  0x1b   : > { %p1216_p3 = pneg %p1215_p0 }
  0x1d   : > { %p1221_p7 = pnand %p1219_p5, %p1216_p3 }
  0x1f   : > { %1224 = shalt.err (!%p1221_p7)
}
  0x20   : > { %s1225_s9 = scalar_lea.vmem %s171_s26, 1024  ;;  %p1233_p1 = scmp.lt.s32.totalorder %s171_s26, %s171_s26 }
  0x21   : > { %p1226_p9 = scmp.ne.s32.totalorder %s171_s26, %s1225_s9  ;;  %p1234_p4 = scmp.lt.s32.totalorder %s1225_s9, %s1225_s9 }
  0x23   : > { %p1228_p10 = pnand %p1226_p9, %p1214_p13  ;;  %p1235_p8 = por %p1234_p4, %p1233_p1 }
  0x25   : > { %p1229_p6 = pneg %p1228_p10 }
  0x27   : > { %p1236_p2 = pnand %p1235_p8, %p1229_p6 }
  0x29   : > { %1239 = shalt.err (!%p1236_p2)
}
  0x2a   : > { %s1359_s10 = smov 64   ;;  %s1360_s11 = smov 4  }
  0x2b   : > { %1121 = dma.hbm_to_vmem [thread:$0]  (!%p1448_p11), %s1702_s1, 1024, %s171_s26, [#allocation6], %s1359_s10, %s1359_s10, %s1360_s11  }
  0x2c   : > { %p41_p1 = scmp.ge.s32.totalorder %s39_s28, 2  ;;  %s48_s25 = sadd.s32 1, %s1344_s14 }
  0x2d   : > { %p55_p2 = scmp.ne.s32.totalorder %s1344_s14, %s1340_s13  ;;  %p56_p4 = scmp.eq.s32.totalorder %s1356_s17, 0 }
  0x2e   : > { %s1730_s28 = smov (%p41_p1, %s39_s28), 0  ;;  %p1716_p8 = scmp.ne.s32.totalorder %s1710_s21, 0 }
  0x2f   : > { %p1478_p6 = por %p56_p4, %p55_p2  ;;  %s43_s30 = ssub.s32 %s1352_s16, %s1730_s28 }
  0x30   : > { %p1484_p10 = por %p1716_p8, %p55_p2  ;;  %p1131_p12 = scmp.lt.s32.totalorder %s1356_s17, 2 }
  0x31   : > { %p46_p11 = scmp.eq.s32.totalorder %s43_s30, 0  ;;  %s190_s26 = sand.u32 1, %s1344_s14  }
  0x32   : > { %s983_s4 = sshll.u32 %s190_s26, 7  ;;  %s1020_s6 = sshll.u32 %s1352_s16, 11 }
  0x33   : > { %s1493_s5 = scalar_select %p46_p11, %s1344_s14, %s48_s25  }
  0x34   : > { %s1499_s9 = scalar_lea.hbm %s1701_s0, %s1020_s6  ;;  %s194_s21 = scalar_lea.vmem [#allocation2], %s983_s4 }
  0x35   : > { %s202_s18 = sshll.u32 %s194_s21, 4  ;;  %p1505_p13 = pnand %p1131_p12, %p1478_p6  ;;  %s1501_s18 = int_to_ptr.vmem [resolvable:$true] %s202_s18 }
  0x36   : > { %s1509_s25 = scalar_lea.sflag [#allocation3], %s190_s26  ;;  %s1240_s30 = scalar_lea.hbm %s1499_s9, 2048 }
  0x37   : > { %p1241_p0 = scmp.ne.s32.totalorder %s1499_s9, %s1240_s30  ;;  %p1242_p3 = pneg %p1505_p13 }
  0x38   : > { %s1245_s29 = scalar_lea.hbm %s1701_s0, 4096  ;;  %p1246_p9 = scmp.lt.u32.totalorder %s1499_s9, %s1701_s0 }
  0x39   : > { %p1243_p5 = pnand %p1242_p3, %p1241_p0  ;;  %p1247_p1 = scmp.lt.u32.totalorder %s1245_s29, %s1240_s30 }
  0x3a   : > { %p1249_p4 = scmp.lt.u32.totalorder %s1240_s30, %s1499_s9 }
  0x3b   : > { %p1244_p7 = pneg %p1243_p5  ;;  %p1248_p2 = por %p1247_p1, %p1246_p9 }
  0x3d   : > { %p1250_p6 = por %p1249_p4, %p1248_p2 }
  0x3f   : > { %p1251_p8 = pnand %p1250_p6, %p1244_p7 }
  0x41   : > { %1254 = shalt.err (!%p1251_p8)
}
  0x42   : > { %s1255_s26 = scalar_lea.vmem %s1501_s18, 2048  ;;  %s1361_s21 = smov [#allocation2]  }
  0x43   : > { %p1256_p12 = scmp.ne.s32.totalorder %s1501_s18, %s1255_s26  ;;  %s1260_s4 = sshll.u32 %s1361_s21, 4  ;;  %s1261_s4 = int_to_ptr.vmem [resolvable:$false] %s1260_s4 }
  0x44   : > { %s1262_s6 = scalar_lea.vmem %s1261_s4, 4096  ;;  %p1263_p5 = scmp.lt.s32.totalorder %s1501_s18, %s1261_s4 }
  0x45   : > { %p1258_p11 = pnand %p1256_p12, %p1242_p3  ;;  %p1264_p9 = scmp.lt.s32.totalorder %s1262_s6, %s1255_s26 }
  0x47   : > { %p1259_p0 = pneg %p1258_p11  ;;  %p1265_p1 = por %p1264_p9, %p1263_p5 }
  0x49   : > { %p1266_p2 = pnand %p1265_p1, %p1259_p0 }
  0x4b   : > { %1269 = shalt.err (!%p1266_p2)
}
  0x4c   : > { %1125 = dma.hbm_to_vmem [thread:$0]  (!%p1505_p13), %s1499_s9, 2048, %s1501_s18, %s1509_s25, %s1359_s10, %s1359_s10, %s1360_s11  }
  0x4d   : > { %p1719_p3 = scmp.ne.s32.totalorder %s1713_s24, 0 }
  0x4e   : > { %s1543_s30 = sand.u32 (!%p1719_p3), 1, %s1340_s13   ;;  %p1720_p7 = scmp.ne.s32.totalorder (!%p1719_p3), %s1711_s22, 0 }
  0x4f   : > { %214 = sbr.rel (%p1719_p3) target bundleno = 379 (0x17b), region = 32  ;;  %s987_s29 = sshll.u32 (!%p1719_p3), %s1543_s30, 7 }
  0x50   : > { %s217_s7 = scalar_lea.sflag (!%p1719_p3), [#allocation3], %s1543_s30  ;;  %s1547_s8 = scalar_lea.vmem (!%p1719_p3), [#allocation2], %s987_s29 }
  0x56   : > { %1323 = dma.done.wait (%p1720_p7), %s217_s7, 2048  }
  0x57   : > { %1325 = vsyncadd (%p1720_p7), %s217_s7, 4294965248  ;;  %p1721_p13 = scmp.ne.s32.totalorder %s1709_s20, 0 }
  0x59   : > { %1327 = dma.done.wait (%p1721_p13), [#allocation6], 1024  }
  0x5a   : > { %1329 = vsyncadd (%p1721_p13), [#allocation6], 4294966272  ;;  %v1188_v0 = vld [vmem:[#allocation5] sm:$0xff]   ;;  %v1189_v1 = vld [vmem:[#allocation5 + $0x8] sm:$0xff]   ;;  %s989_s20 = sshll.u32 %s1543_s30, 8  ;;  %s1021_s11 = sshll.u32 %s1348_s15, 12 }
  0x5b   : > { %1046 = vmatprep.subr.bf16.mxu0 %v1188_v0  ;;  %1094 = vmatprep.subr.bf16.mxu1 %v1188_v0  ;;  %v1190_v2 = vld [vmem:[#allocation5 + $0x10] sm:$0xff]   ;;  %v1191_v3 = vld [vmem:[#allocation5 + $0x18] sm:$0xff]   ;;  %v1196_v4 = vld [vmem:[%s1547_s8] sm:$0xff]   ;;  %s1583_s10 = scalar_lea.vmem [#allocation7], %s989_s20  ;;  %s1642_s19 = scalar_lea.hbm %s1704_s3, %s1021_s11 }
  0x5c   : > { %1047 = vmatpush3.bf16.msra.mxu0 %v1188_v0  ;;  %1102 = vmatpush3.bf16.msra.mxu1 %v1188_v0  ;;  %v1197_v5 = vld [vmem:[%s1547_s8 + $0x40] sm:$0xff]   ;;  %v1193_v7 = vld [vmem:[#allocation5 + $0x28] sm:$0xff]   ;;  %v1194_v8 = vld [vmem:[#allocation5 + $0x30] sm:$0xff]   ;;  %s863_s9 = sshll.u32 %s1583_s10, 4  ;;  %s849_s25 = scalar_lea.sflag [#allocation4], %s1543_s30  ;;  %s1644_s9 = int_to_ptr.vmem [resolvable:$true] %s863_s9 }
  0x5d   : > { %1048 = vmatprep.subr.bf16.mxu0 %v1189_v1  ;;  %1095 = vmatprep.subr.bf16.mxu1 %v1189_v1  ;;  %v1192_v6 = vld [vmem:[#allocation5 + $0x20] sm:$0xff]   ;;  %v1195_v9 = vld [vmem:[#allocation5 + $0x38] sm:$0xff]   ;;  %v1198_v10 = vld [vmem:[%s1547_s8 + $0x8] sm:$0xff]   ;;  %s1270_s26 = scalar_lea.vmem %s1644_s9, 4096  ;;  %s1362_s21 = smov [#allocation7]  }
  0x5e   : > { %1062 = vmatprep.mubr.bf16.mxu0 %v1196_v4  ;;  %1078 = vmatprep.mubr.bf16.mxu1 %v1197_v5  ;;  %v1199_v11 = vld [vmem:[%s1547_s8 + $0x48] sm:$0xff]   ;;  %v1200_v12 = vld [vmem:[%s1547_s8 + $0x10] sm:$0xff]   ;;  %v1202_v14 = vld [vmem:[%s1547_s8 + $0x18] sm:$0xff]   ;;  %p1271_p4 = scmp.ne.s32.totalorder %s1644_s9, %s1270_s26  ;;  %s1274_s4 = sshll.u32 %s1362_s21, 4  ;;  %s1275_s4 = int_to_ptr.vmem [resolvable:$false] %s1274_s4 }
  0x5f   : > { %v1201_v13 = vld [vmem:[%s1547_s8 + $0x50] sm:$0xff]   ;;  %v1203_v15 = vld [vmem:[%s1547_s8 + $0x58] sm:$0xff]   ;;  %v1204_v16 = vld [vmem:[%s1547_s8 + $0x20] sm:$0xff]   ;;  %s1276_s6 = scalar_lea.vmem %s1275_s4, 8192  ;;  %p1277_p12 = scmp.lt.s32.totalorder %s1644_s9, %s1275_s4 }
  0x60   : > { %1049 = vmatpush3.bf16.msra.mxu0 %v1189_v1  ;;  %1103 = vmatpush3.bf16.msra.mxu1 %v1189_v1  ;;  %v1205_v17 = vld [vmem:[%s1547_s8 + $0x60] sm:$0xff]   ;;  %v1206_v18 = vld [vmem:[%s1547_s8 + $0x28] sm:$0xff]   ;;  %v1208_v20 = vld [vmem:[%s1547_s8 + $0x30] sm:$0xff]   ;;  %p1272_p6 = pnand %p1271_p4, %p1484_p10  ;;  %p1278_p11 = scmp.lt.s32.totalorder %s1276_s6, %s1270_s26 }
  0x61   : > { %1050 = vmatprep.subr.bf16.mxu0 %v1190_v2  ;;  %1096 = vmatprep.subr.bf16.mxu1 %v1190_v2  ;;  %v1207_v19 = vld [vmem:[%s1547_s8 + $0x68] sm:$0xff]   ;;  %v1209_v21 = vld [vmem:[%s1547_s8 + $0x70] sm:$0xff]   ;;  %v1210_v22 = vld [vmem:[%s1547_s8 + $0x38] sm:$0xff]  }
  0x62   : > { %v1211_v23 = vld [vmem:[%s1547_s8 + $0x78] sm:$0xff]   ;;  %v1577_v25 = vld [vmem:[%s1703_s2] ss:$0 sm:$0xff]  ;;  %p1273_p8 = pneg %p1272_p6  ;;  %p1279_p0 = por %p1278_p11, %p1277_p12 }
  0x64   : > { %1051 = vmatpush3.bf16.msra.mxu0 %v1190_v2  ;;  %1104 = vmatpush3.bf16.msra.mxu1 %v1190_v2  ;;  %p1280_p5 = pnand %p1279_p0, %p1273_p8 }
  0x65   : > { %1052 = vmatprep.subr.bf16.mxu0 %v1191_v3  ;;  %1097 = vmatprep.subr.bf16.mxu1 %v1191_v3 }
  0x68   : > { %1053 = vmatpush3.bf16.msra.mxu0 %v1191_v3  ;;  %1105 = vmatpush3.bf16.msra.mxu1 %v1191_v3 }
  0x69   : > { %1054 = vmatprep.subr.bf16.mxu0 %v1192_v6  ;;  %1098 = vmatprep.subr.bf16.mxu1 %v1192_v6 }
  0x6c   : > { %1055 = vmatpush3.bf16.msra.mxu0 %v1192_v6  ;;  %1106 = vmatpush3.bf16.msra.mxu1 %v1192_v6 }
  0x6d   : > { %1056 = vmatprep.subr.bf16.mxu0 %v1193_v7  ;;  %1099 = vmatprep.subr.bf16.mxu1 %v1193_v7 }
  0x70   : > { %1057 = vmatpush3.bf16.msra.mxu0 %v1193_v7  ;;  %1107 = vmatpush3.bf16.msra.mxu1 %v1193_v7 }
  0x71   : > { %1058 = vmatprep.subr.bf16.mxu0 %v1194_v8  ;;  %1100 = vmatprep.subr.bf16.mxu1 %v1194_v8 }
  0x74   : > { %1059 = vmatpush3.bf16.msra.mxu0 %v1194_v8  ;;  %1108 = vmatpush3.bf16.msra.mxu1 %v1194_v8 }
  0x75   : > { %1060 = vmatprep.subr.bf16.mxu0 %v1195_v9  ;;  %1101 = vmatprep.subr.bf16.mxu1 %v1195_v9 }
  0x78   : > { %1061 = vmatpush3.bf16.msra.mxu0 %v1195_v9  ;;  %1109 = vmatpush3.bf16.msra.mxu1 %v1195_v9 }
  0x7b   : > { %1063 = vmatmul.mubr.bf16.vlgmr.msra.gmra.mrb[0].mxu0 %v1198_v10  ;;  %1079 = vmatmul.mubr.bf16.vlgmr.msra.gmra.mrb[0].mxu1 %v1199_v11 }
  0x7c   : > { %1066 = vmatprep.mubr.bf16.mxu0 %v1200_v12  ;;  %1082 = vmatprep.mubr.bf16.mxu1 %v1201_v13 }
  0x83   : > { %1067 = vmatmul.mubr.bf16.gmra.mrb[4].mxu0 %v1202_v14  ;;  %1083 = vmatmul.mubr.bf16.gmra.mrb[4].mxu1 %v1203_v15 }
  0x84   : > { %1070 = vmatprep.mubr.bf16.mxu0 %v1204_v16  ;;  %1086 = vmatprep.mubr.bf16.mxu1 %v1205_v17 }
  0x8b   : > { %1071 = vmatmul.mubr.bf16.gmra.mrb[8].mxu0 %v1206_v18  ;;  %1087 = vmatmul.mubr.bf16.gmra.mrb[8].mxu1 %v1207_v19 }
  0x8c   : > { %1074 = vmatprep.mubr.bf16.mxu0 %v1208_v20  ;;  %1090 = vmatprep.mubr.bf16.mxu1 %v1209_v21 }
  0x93   : > { %1075 = vmatmul.mubr.bf16.gmra.mrb[12].mxu0 %v1210_v22  ;;  %1091 = vmatmul.mubr.bf16.gmra.mrb[12].mxu1 %v1211_v23 }
 0x14e   : > { %v1064_v24 = vpop.f32.mrb[0].mxu0  ;;  %v1080_v26 = vpop.f32.mrb[0].mxu1 }
 0x14f   : > { %v551_v27 = vpop.f32.mrb[1].mxu0  ;;  %v615_v28 = vpop.f32.mrb[1].mxu1  ;;  %v786_v31 = vadd.f32 %v1064_v24, %v1577_v25  ;;  %v802_v32 = vadd.f32 %v1080_v26, %v1577_v25 }
 0x150   : > { %v1065_v29 = vpop.f32.mrb[2].mxu0  ;;  %v1081_v30 = vpop.f32.mrb[2].mxu1  ;;  %v784_v35 = vadd.f32 %v1577_v25, %v551_v27  ;;  %v800_v36 = vadd.f32 %v1577_v25, %v615_v28 }
 0x151   : > { %v554_v33 = vpop.f32.mrb[3].mxu0  ;;  %v618_v34 = vpop.f32.mrb[3].mxu1  ;;  %818 = vst [vmem:[%s1583_s10 + $0x10] sm:$0xff] %v786_v31  ;;  %834 = vst [vmem:[%s1583_s10 + $0x90] sm:$0xff] %v802_v32  ;;  %v787_v37 = vadd.f32 %v1065_v29, %v1577_v25  ;;  %v803_v38 = vadd.f32 %v1081_v30, %v1577_v25 }
 0x152   : > { %816 = vst [vmem:[%s1583_s10] sm:$0xff] %v784_v35  ;;  %832 = vst [vmem:[%s1583_s10 + $0x80] sm:$0xff] %v800_v36  ;;  %v785_v39 = vadd.f32 %v1577_v25, %v554_v33  ;;  %v801_v40 = vadd.f32 %v1577_v25, %v618_v34 }
 0x153   : > { %819 = vst [vmem:[%s1583_s10 + $0x18] sm:$0xff] %v787_v37  ;;  %835 = vst [vmem:[%s1583_s10 + $0x98] sm:$0xff] %v803_v38 }
 0x154   : > { %817 = vst [vmem:[%s1583_s10 + $0x8] sm:$0xff] %v785_v39  ;;  %833 = vst [vmem:[%s1583_s10 + $0x88] sm:$0xff] %v801_v40 }
 0x156   : > { %v1068_v41 = vpop.f32.mrb[4].mxu0  ;;  %v1084_v42 = vpop.f32.mrb[4].mxu1 }
 0x157   : > { %v567_v43 = vpop.f32.mrb[5].mxu0  ;;  %v631_v44 = vpop.f32.mrb[5].mxu1  ;;  %v790_v47 = vadd.f32 %v1068_v41, %v1577_v25  ;;  %v806_v48 = vadd.f32 %v1084_v42, %v1577_v25 }
 0x158   : > { %v1069_v45 = vpop.f32.mrb[6].mxu0  ;;  %v1085_v46 = vpop.f32.mrb[6].mxu1  ;;  %v788_v51 = vadd.f32 %v1577_v25, %v567_v43  ;;  %v804_v52 = vadd.f32 %v1577_v25, %v631_v44 }
 0x159   : > { %v570_v49 = vpop.f32.mrb[7].mxu0  ;;  %v634_v50 = vpop.f32.mrb[7].mxu1  ;;  %822 = vst [vmem:[%s1583_s10 + $0x30] sm:$0xff] %v790_v47  ;;  %838 = vst [vmem:[%s1583_s10 + $0xb0] sm:$0xff] %v806_v48  ;;  %v791_v53 = vadd.f32 %v1069_v45, %v1577_v25  ;;  %v807_v54 = vadd.f32 %v1085_v46, %v1577_v25 }
 0x15a   : > { %820 = vst [vmem:[%s1583_s10 + $0x20] sm:$0xff] %v788_v51  ;;  %836 = vst [vmem:[%s1583_s10 + $0xa0] sm:$0xff] %v804_v52  ;;  %v789_v55 = vadd.f32 %v1577_v25, %v570_v49  ;;  %v805_v56 = vadd.f32 %v1577_v25, %v634_v50 }
 0x15b   : > { %823 = vst [vmem:[%s1583_s10 + $0x38] sm:$0xff] %v791_v53  ;;  %839 = vst [vmem:[%s1583_s10 + $0xb8] sm:$0xff] %v807_v54 }
 0x15c   : > { %821 = vst [vmem:[%s1583_s10 + $0x28] sm:$0xff] %v789_v55  ;;  %837 = vst [vmem:[%s1583_s10 + $0xa8] sm:$0xff] %v805_v56 }
 0x15e   : > { %v1072_v57 = vpop.f32.mrb[8].mxu0  ;;  %v1088_v58 = vpop.f32.mrb[8].mxu1 }
 0x15f   : > { %v583_v59 = vpop.f32.mrb[9].mxu0  ;;  %v647_v60 = vpop.f32.mrb[9].mxu1  ;;  %v794_v63 = vadd.f32 %v1072_v57, %v1577_v25  ;;  %v810_v0 = vadd.f32 %v1088_v58, %v1577_v25 }
 0x160   : > { %v1073_v61 = vpop.f32.mrb[10].mxu0  ;;  %v1089_v62 = vpop.f32.mrb[10].mxu1  ;;  %v792_v3 = vadd.f32 %v1577_v25, %v583_v59  ;;  %v808_v4 = vadd.f32 %v1577_v25, %v647_v60 }
 0x161   : > { %v586_v1 = vpop.f32.mrb[11].mxu0  ;;  %v650_v2 = vpop.f32.mrb[11].mxu1  ;;  %826 = vst [vmem:[%s1583_s10 + $0x50] sm:$0xff] %v794_v63  ;;  %842 = vst [vmem:[%s1583_s10 + $0xd0] sm:$0xff] %v810_v0  ;;  %v795_v5 = vadd.f32 %v1073_v61, %v1577_v25  ;;  %v811_v6 = vadd.f32 %v1089_v62, %v1577_v25 }
 0x162   : > { %824 = vst [vmem:[%s1583_s10 + $0x40] sm:$0xff] %v792_v3  ;;  %840 = vst [vmem:[%s1583_s10 + $0xc0] sm:$0xff] %v808_v4  ;;  %v793_v7 = vadd.f32 %v1577_v25, %v586_v1  ;;  %v809_v8 = vadd.f32 %v1577_v25, %v650_v2 }
 0x163   : > { %827 = vst [vmem:[%s1583_s10 + $0x58] sm:$0xff] %v795_v5  ;;  %843 = vst [vmem:[%s1583_s10 + $0xd8] sm:$0xff] %v811_v6 }
 0x164   : > { %825 = vst [vmem:[%s1583_s10 + $0x48] sm:$0xff] %v793_v7  ;;  %841 = vst [vmem:[%s1583_s10 + $0xc8] sm:$0xff] %v809_v8 }
 0x166   : > { %v1076_v9 = vpop.f32.mrb[12].mxu0  ;;  %v1092_v10 = vpop.f32.mrb[12].mxu1 }
 0x167   : > { %v599_v11 = vpop.f32.mrb[13].mxu0  ;;  %v663_v12 = vpop.f32.mrb[13].mxu1  ;;  %v798_v15 = vadd.f32 %v1076_v9, %v1577_v25  ;;  %v814_v16 = vadd.f32 %v1092_v10, %v1577_v25 }
 0x168   : > { %v1077_v13 = vpop.f32.mrb[14].mxu0  ;;  %v1093_v14 = vpop.f32.mrb[14].mxu1  ;;  %v796_v19 = vadd.f32 %v1577_v25, %v599_v11  ;;  %v812_v20 = vadd.f32 %v1577_v25, %v663_v12 }
 0x169   : > { %v602_v17 = vpop.f32.mrb[15].mxu0  ;;  %v666_v18 = vpop.f32.mrb[15].mxu1  ;;  %830 = vst [vmem:[%s1583_s10 + $0x70] sm:$0xff] %v798_v15  ;;  %846 = vst [vmem:[%s1583_s10 + $0xf0] sm:$0xff] %v814_v16  ;;  %v799_v21 = vadd.f32 %v1077_v13, %v1577_v25  ;;  %v815_v22 = vadd.f32 %v1093_v14, %v1577_v25 }
 0x16a   : > { %828 = vst [vmem:[%s1583_s10 + $0x60] sm:$0xff] %v796_v19  ;;  %844 = vst [vmem:[%s1583_s10 + $0xe0] sm:$0xff] %v812_v20  ;;  %v797_v23 = vadd.f32 %v1577_v25, %v602_v17  ;;  %v813_v24 = vadd.f32 %v1577_v25, %v666_v18 }
 0x16b   : > { %831 = vst [vmem:[%s1583_s10 + $0x78] sm:$0xff] %v799_v21  ;;  %847 = vst [vmem:[%s1583_s10 + $0xf8] sm:$0xff] %v815_v22 }
 0x16c   : > { %829 = vst [vmem:[%s1583_s10 + $0x68] sm:$0xff] %v797_v23  ;;  %845 = vst [vmem:[%s1583_s10 + $0xe8] sm:$0xff] %v813_v24 }
 0x16d   : > { %1283 = shalt.err (!%p1280_p5)
}
 0x16e   : > { %s1284_s29 = scalar_lea.hbm %s1642_s19, 4096  ;;  %s1288_s20 = scalar_lea.hbm %s1704_s3, 8192 }
 0x16f   : > { %p1285_p9 = scmp.ne.s32.totalorder %s1642_s19, %s1284_s29  ;;  %p1289_p3 = scmp.lt.u32.totalorder %s1642_s19, %s1704_s3 }
 0x170   : > { %p1290_p7 = scmp.lt.u32.totalorder %s1288_s20, %s1284_s29  ;;  %p1292_p4 = scmp.lt.u32.totalorder %s1284_s29, %s1642_s19 }
 0x171   : > { %p1286_p1 = pnand %p1285_p9, %p1484_p10 }
 0x172   : > { %p1291_p13 = por %p1290_p7, %p1289_p3 }
 0x173   : > { %p1287_p2 = pneg %p1286_p1 }
 0x174   : > { %p1293_p6 = por %p1292_p4, %p1291_p13 }
 0x176   : > { %p1294_p8 = pnand %p1293_p6, %p1287_p2 }
 0x178   : > { %1297 = shalt.err (!%p1294_p8)
}
 0x179   : > { %s1363_s10 = smov 128   ;;  %s1364_s11 = smov 8  }
 0x17a   : > { %1116 = dma.vmem_to_hbm [thread:$0]  (%p1484_p10), %s1644_s9, 4096, %s1642_s19, %s849_s25, %s1363_s10, %s1363_s10, %s1364_s11  }
 0x17b PF: > { %s878_s15 = sand.u32 1, %s1336_s12   ;;  %p1722_p12 = scmp.ne.s32.totalorder %s1712_s23, 0 }
 0x17c   : > { %p1723_p11 = scmp.ge.s32.totalorder %s1356_s17, 2  ;;  %s879_s18 = scalar_lea.sflag [#allocation4], %s878_s15 }
 0x17e   : > { %p1127_p0 = pnand %p1723_p11, %p1722_p12 }
 0x180   : > { %1331 = dma.done.wait (!%p1127_p0), %s879_s18, 4096  }
 0x181   : > { %1333 = vsyncadd (!%p1127_p0), %s879_s18, 4294963200  ;;  %s20_s17 = sadd.s32 1, %s1356_s17   ;;  %s1724_s12 = smov %s1340_s13 }
 0x182   : > { %p17_p5 = scmp.ge.s32.totalorder %s20_s17, 4   ;;  %s1725_s13 = smov %s1344_s14 }
 0x183   : > { %s1726_s14 = smov %s1493_s5  ;;  %s1727_s15 = smov %s1352_s16 }
 0x184   : > { %s1728_s16 = smov %s1730_s28  ;;  %19 = sbr.rel (!%p17_p5) target bundleno = 7 (0x7), region = 93 }
 0x18b   :  { %884 = vsyncpa [#allocation3], 1 }
 0x18c   :  { %886 = vsyncpa [#allocation3 + $0x1], 1 }
 0x18d   :  { %887 = vsyncpa [#allocation6], 1 }
 0x18e   :  { %888 = vsyncpa [#allocation4], 1 }
 0x18f   :  { %890 = vsyncpa [#allocation4 + $0x1], 1 }

</bundles_post_ra>
